<compile_context>
chip_gen: v7x
topology: tpu7x:2x2x1
jax: 0.10.0
libtpu: 0.0.40
codegen_flags: <defaults>
</compile_context>

<pallas_src>
import jax
import jax.numpy as jnp
from jax.experimental import pallas as pl
from jax.experimental.pallas import tpu as pltpu


def _round_up(x, m):
    return ((x + m - 1) // m) * m


# ----------------------------- Pallas kernels -----------------------------

def _make_fused_kernel(Fp, C, T, TMt, r):
    """In-VMEM framing -> windowed DFT -> log-power -> chimera heads ->
    comp_mul(com, X) -> one-sided real IDFT, all in one pass (X never hits HBM)."""
    two_fp = 2 * Fp

    def kernel(h_ref, basis_ref, we_ref, be_ref, wc_ref, bc_ref,
               binv_re_ref, binv_im_ref, embd_ref, com_ref, rec_ref):
        t0 = pl.program_id(1) * TMt
        # Build the (TMt, n_fft) frame tile from the non-redundant hop-framed
        # audio slab: frame t is slab rows t .. t+r-1 laid out along lanes.
        parts = [h_ref[pl.ds(t0 + j, TMt), :] for j in range(r)]
        frames = jnp.concatenate(parts, axis=1).astype(jnp.bfloat16)    # (TMt, n_fft)

        # Windowed one-sided DFT (analysis window baked into the basis).
        reim = jnp.dot(frames, basis_ref[...],
                       preferred_element_type=jnp.float32)              # (TMt, 2Fp)
        # Zero spectra of padded frames (t >= T) so framing matches torch.stft.
        t_idx = t0 + jax.lax.broadcasted_iota(jnp.int32, (TMt, 1), 0)
        reim = jnp.where(t_idx < T, reim, 0.0)
        re = reim[:, :Fp]
        im = reim[:, Fp:]

        # 10*log10(|X|^2).  torch clamps at 1e-40 which is subnormal in f32 and
        # flushed to zero on TPU (-> -inf); use a normal-range floor instead.
        power = re * re + im * im
        lp = (10.0 * jnp.log10(jnp.maximum(power, 1e-37))).astype(jnp.bfloat16)

        # Chimera stand-in heads (embedding + complex mask), f32 accumulation.
        embd_ref[...] = jnp.tanh(
            jnp.dot(lp, we_ref[...], preferred_element_type=jnp.float32) + be_ref[...])
        com = jnp.tanh(
            jnp.dot(lp, wc_ref[...], preferred_element_type=jnp.float32) + bc_ref[...])
        com_ref[...] = com

        # comp_mul(com, X) + one-sided real IDFT (synthesis window baked in);
        # two dots per source instead of a lane-concatenated single dot.
        for c in range(C):
            cre = com[:, c * two_fp:c * two_fp + Fp]
            cim = com[:, c * two_fp + Fp:(c + 1) * two_fp]
            yre = (cre * re - cim * im).astype(jnp.bfloat16)
            yim = (cre * im + cim * re).astype(jnp.bfloat16)
            rec = (jnp.dot(yre, binv_re_ref[...], preferred_element_type=jnp.float32)
                   + jnp.dot(yim, binv_im_ref[...], preferred_element_type=jnp.float32))
            rec_ref[c] = rec.astype(rec_ref.dtype)

    return kernel


def _make_ola_kernel(Tr_pad, hop, r):
    """Overlap-add for one (c, b): accumulate r shifted slabs in registers,
    single store scaled by the precomputed reciprocal NOLA envelope."""
    def kernel(fr_ref, ienv_ref, out_ref):
        fr = fr_ref[...].astype(jnp.float32)                            # (T_pad, n_fft)
        acc = jnp.zeros((Tr_pad, hop), jnp.float32)
        for j in range(r):
            acc = acc + jnp.pad(fr[:, j * hop:(j + 1) * hop],
                                ((j, r - 1 - j), (0, 0)))
        out_ref[...] = acc * ienv_ref[...]
        # TODO(synk): for hop < 128 the output stores are lane-masked; pack
        # multiple batches onto lanes for a lane-dense out block in production.
    return kernel


# ----------------------------- module -----------------------------

class AdaptedChimeraMagPhasebookPallas:
    """JAX/Pallas port of AdaptedChimeraMagPhasebook (Stft -> chimera -> comp_mul -> Istft)."""

    def __init__(self, n_fft, hop_length, win_length, n_sources, embd_dim, key):
        assert win_length == n_fft, "window zero-padding not implemented (win_length == n_fft)"
        assert n_fft % hop_length == 0, "overlap-add kernel requires hop | n_fft"
        self.n_fft = n_fft
        self.hop = hop_length
        self.r = n_fft // hop_length
        self.C = n_sources
        self.D = embd_dim
        F = n_fft // 2 + 1
        self.F = F
        self.Fp = _round_up(F, 128)          # lane-padded frequency axis
        self.Dp = _round_up(embd_dim, 128)   # lane-padded embedding axis
        Fp, Dp, C = self.Fp, self.Dp, self.C

        n = jnp.arange(n_fft, dtype=jnp.float32)
        # periodic Hann window (torch.hann_window default)
        self.window = (0.5 * (1.0 - jnp.cos(2.0 * jnp.pi * n / n_fft))).astype(jnp.float32)

        k = jnp.arange(F, dtype=jnp.float32)
        ang = 2.0 * jnp.pi * jnp.outer(n, k) / n_fft                    # (n_fft, F)
        cosw = self.window[:, None] * jnp.cos(ang)                      # analysis, window baked in
        sinw = -self.window[:, None] * jnp.sin(ang)
        basis_fwd = jnp.zeros((n_fft, 2 * Fp), jnp.float32)
        basis_fwd = basis_fwd.at[:, :F].set(cosw).at[:, Fp:Fp + F].set(sinw)
        self.basis_fwd = basis_fwd.astype(jnp.bfloat16)                 # X = frames @ basis_fwd

        # One-sided real IDFT bases split into [cos | sin] halves (two-dot IDFT),
        # synthesis window baked in.  DC/Nyquist imaginary rows are exactly zero,
        # matching torch.istft (irfft ignores them).
        ki = jnp.arange(F)
        ck = jnp.where((ki == 0) | (ki == n_fft // 2), 1.0, 2.0).astype(jnp.float32)
        ci = ck[:, None] * jnp.cos(ang.T) / n_fft * self.window[None, :]
        si = -ck[:, None] * jnp.sin(ang.T) / n_fft * self.window[None, :]
        self.basis_inv_re = (jnp.zeros((Fp, n_fft), jnp.float32)
                             .at[:F].set(ci).astype(jnp.bfloat16))
        self.basis_inv_im = (jnp.zeros((Fp, n_fft), jnp.float32)
                             .at[:F].set(si).astype(jnp.bfloat16))

        # TODO(synk): the real `chimera` module is external/unspecified; using a
        # deterministic per-frame linear+tanh stand-in producing (embd, complex mask).
        k1, k2 = jax.random.split(key)
        we = jax.random.normal(k1, (F, embd_dim), jnp.float32) / jnp.sqrt(F)
        self.W_e = (jnp.zeros((Fp, Dp), jnp.float32)
                    .at[:F, :embd_dim].set(we).astype(jnp.bfloat16))
        self.b_e = jnp.zeros((1, Dp), jnp.float32)
        wc = jax.random.normal(k2, (F, C, 2, F), jnp.float32) / jnp.sqrt(F)
        W_c = jnp.zeros((Fp, C, 2, Fp), jnp.float32).at[:F, :, :, :F].set(wc)
        self.W_c = W_c.reshape(Fp, C * 2 * Fp).astype(jnp.bfloat16)     # padded lanes stay 0
        self.b_c = jnp.zeros((1, C * 2 * Fp), jnp.float32)

    def __call__(self, x, states=None):
        n_fft, hop, r = self.n_fft, self.hop, self.r
        F, Fp, C, D, Dp = self.F, self.Fp, self.C, self.D, self.Dp
        C2Fp = C * 2 * Fp
        B, L = x.shape
        pad = n_fft // 2

        # ---- STFT framing setup (center=True, reflect pad) ----
        x_pad = jnp.pad(x, ((0, 0), (pad, pad)), mode="reflect")
        Lp = L + 2 * pad
        T = 1 + (Lp - n_fft) // hop
        T_pad = _round_up(T, 8)
        TMt = 8
        for d in range(min(256, T_pad), 7, -8):                         # largest tile | T_pad
            if T_pad % d == 0:
                TMt = d
                break
        nt = T_pad // TMt
        # Non-redundant hop-framed audio slab (B, U, hop); frames are rebuilt
        # inside the kernel, so there is no r-fold-redundant HBM gather.
        U = _round_up(max(T_pad + r - 1, pl.cdiv(Lp, hop)), 8)
        x_ext = jnp.pad(x_pad, ((0, 0), (0, U * hop - Lp)))
        slab = x_ext.reshape(B, U, hop)

        # ---- fused kernel: framing + DFT + log-power + chimera + mask + IDFT ----
        embd_p, com_p, rec = pl.pallas_call(
            _make_fused_kernel(Fp, C, T, TMt, r),
            grid=(B, nt),
            in_specs=[
                pl.BlockSpec((None, U, hop), lambda b, i: (b, 0, 0)),     # audio slab (per batch)
                pl.BlockSpec((n_fft, 2 * Fp), lambda b, i: (0, 0)),       # analysis basis
                pl.BlockSpec((Fp, Dp), lambda b, i: (0, 0)),              # W_e
                pl.BlockSpec((1, Dp), lambda b, i: (0, 0)),               # b_e
                pl.BlockSpec((Fp, C2Fp), lambda b, i: (0, 0)),            # W_c
                pl.BlockSpec((1, C2Fp), lambda b, i: (0, 0)),             # b_c
                pl.BlockSpec((Fp, n_fft), lambda b, i: (0, 0)),           # synthesis cos
                pl.BlockSpec((Fp, n_fft), lambda b, i: (0, 0)),           # synthesis sin
            ],
            out_specs=[
                pl.BlockSpec((None, TMt, Dp), lambda b, i: (b, i, 0)),
                pl.BlockSpec((None, TMt, C2Fp), lambda b, i: (b, i, 0)),
                pl.BlockSpec((None, C, TMt, n_fft), lambda b, i: (b, 0, i, 0)),
            ],
            out_shape=[
                jax.ShapeDtypeStruct((B, T_pad, Dp), jnp.float32),
                jax.ShapeDtypeStruct((B, T_pad, C2Fp), jnp.float32),
                jax.ShapeDtypeStruct((B, C, T_pad, n_fft), jnp.bfloat16),  # bf16 intermediate
            ],
            compiler_params=pltpu.CompilerParams(
                dimension_semantics=("parallel", "arbitrary"),
                vmem_limit_bytes=48 * 1024 * 1024),
        )(slab, self.basis_fwd, self.W_e, self.b_e, self.W_c, self.b_c,
          self.basis_inv_re, self.basis_inv_im)

        # ---- overlap-add + reciprocal-NOLA normalization ----
        Tr_pad = T_pad + r - 1
        w2 = (self.window * self.window).reshape(r, hop)
        env = jnp.zeros((Tr_pad, hop), jnp.float32)
        for j in range(r):
            env = env.at[j:j + T, :].add(w2[j][None, :])                  # only T real frames
        inv_env = 1.0 / jnp.maximum(env, 1e-11)

        ola = pl.pallas_call(
            _make_ola_kernel(Tr_pad, hop, r),
            grid=(C, B),
            in_specs=[
                pl.BlockSpec((None, None, T_pad, n_fft), lambda c, b: (b, c, 0, 0)),
                pl.BlockSpec((Tr_pad, hop), lambda c, b: (0, 0)),
            ],
            out_specs=pl.BlockSpec((None, None, Tr_pad, hop), lambda c, b: (c, b, 0, 0)),
            out_shape=jax.ShapeDtypeStruct((C, B, Tr_pad, hop), jnp.float32),
            compiler_params=pltpu.CompilerParams(
                dimension_semantics=("parallel", "parallel"),
                vmem_limit_bytes=48 * 1024 * 1024),
        )(rec, inv_env)

        # ---- assemble torch-layout outputs ----
        wl = (T - 1) * hop                                                # torch.istft length
        y = ola.reshape(C, B, Tr_pad * hop)
        shat = jnp.transpose(y, (1, 0, 2))[:, :, pad:pad + wl]            # (B, C, wl)

        embd = embd_p[:, :T, :D]                                          # (B, T, D)
        com5 = com_p.reshape(B, T_pad, C, 2, Fp)[:, :T, :, :, :F]         # (B, T, C, 2, F)
        com = jnp.transpose(com5, (0, 2, 4, 1, 3))                        # (B, C, F, T, 2)

        return embd, com, shat, states


# ----------------------------- demo -----------------------------

if __name__ == "__main__":
    B, L = 2, 128
    n_fft, hop, win = 64, 16, 64
    C, D = 2, 16

    key = jax.random.PRNGKey(0)
    kx, kw = jax.random.split(key)
    x = jax.random.normal(kx, (B, L), dtype=jnp.float32)

    model = AdaptedChimeraMagPhasebookPallas(
        n_fft=n_fft, hop_length=hop, win_length=win,
        n_sources=C, embd_dim=D, key=kw)

    embd, com, shat, out_status = model(x, states=None)
    jax.block_until_ready((embd, com, shat))

    T = 1 + L // hop
    F = n_fft // 2 + 1
    assert embd.shape == (B, T, D), embd.shape
    assert com.shape == (B, C, F, T, 2), com.shape
    assert shat.shape == (B, C, L), shat.shape
    assert out_status is None
    assert bool(jnp.all(jnp.isfinite(com)))
    assert bool(jnp.all(jnp.isfinite(shat)))

    print("KERNEL_OK")
</pallas_src>

<mosaic_0001>
module attributes {stable_mosaic.version = 11 : i64} {
  func.func @kernel(%arg0: i32, %arg1: i32, %arg2: memref<1x24x16xf32, #tpu.memory_space<vmem>>, %arg3: memref<64x256xbf16, #tpu.memory_space<vmem>>, %arg4: memref<128x128xbf16, #tpu.memory_space<vmem>>, %arg5: memref<1x128xf32, #tpu.memory_space<vmem>>, %arg6: memref<128x512xbf16, #tpu.memory_space<vmem>>, %arg7: memref<1x512xf32, #tpu.memory_space<vmem>>, %arg8: memref<128x64xbf16, #tpu.memory_space<vmem>>, %arg9: memref<128x64xbf16, #tpu.memory_space<vmem>>, %arg10: memref<1x16x128xf32, #tpu.memory_space<vmem>>, %arg11: memref<1x16x512xf32, #tpu.memory_space<vmem>>, %arg12: memref<1x2x16x64xbf16, #tpu.memory_space<vmem>>) attributes {dimension_semantics = [#tpu.dimension_semantics<parallel>, #tpu.dimension_semantics<arbitrary>], iteration_bounds = array<i64: 2, 1>, scalar_prefetch = 0 : i64, scratch_operands = 0 : i64, tpu.core_type = #tpu.core_type<tc>, window_params = [{transform_indices = @transform_0, window_bounds = array<i64: 1, 24, 16>}, {pipeline_mode = #tpu.pipeline_mode<synchronous>, transform_indices = @transform_1, window_bounds = array<i64: 64, 256>}, {pipeline_mode = #tpu.pipeline_mode<synchronous>, transform_indices = @transform_2, window_bounds = array<i64: 128, 128>}, {pipeline_mode = #tpu.pipeline_mode<synchronous>, transform_indices = @transform_3, window_bounds = array<i64: 1, 128>}, {pipeline_mode = #tpu.pipeline_mode<synchronous>, transform_indices = @transform_4, window_bounds = array<i64: 128, 512>}, {pipeline_mode = #tpu.pipeline_mode<synchronous>, transform_indices = @transform_5, window_bounds = array<i64: 1, 512>}, {pipeline_mode = #tpu.pipeline_mode<synchronous>, transform_indices = @transform_6, window_bounds = array<i64: 128, 64>}, {pipeline_mode = #tpu.pipeline_mode<synchronous>, transform_indices = @transform_7, window_bounds = array<i64: 128, 64>}, {transform_indices = @transform_8, window_bounds = array<i64: 1, 16, 128>}, {transform_indices = @transform_9, window_bounds = array<i64: 1, 16, 512>}, {transform_indices = @transform_10, window_bounds = array<i64: 1, 2, 16, 64>}]} {
    %c16_i32 = arith.constant 16 : i32
    %0 = arith.muli %arg1, %c16_i32 : i32
    %c0_i32 = arith.constant 0 : i32
    %1 = arith.addi %0, %c0_i32 : i32
    %c0 = arith.constant 0 : index
    %2 = arith.index_cast %1 : i32 to index
    %c0_0 = arith.constant 0 : index
    %3 = vector.load %arg2[%c0, %2, %c0_0] : memref<1x24x16xf32, #tpu.memory_space<vmem>>, vector<1x16x16xf32>
    %4 = vector.shape_cast %3 : vector<1x16x16xf32> to vector<16x16xf32>
    %c1_i32 = arith.constant 1 : i32
    %5 = arith.addi %0, %c1_i32 : i32
    %c0_1 = arith.constant 0 : index
    %6 = arith.index_cast %5 : i32 to index
    %c0_2 = arith.constant 0 : index
    %7 = vector.load %arg2[%c0_1, %6, %c0_2] : memref<1x24x16xf32, #tpu.memory_space<vmem>>, vector<1x16x16xf32>
    %8 = vector.shape_cast %7 : vector<1x16x16xf32> to vector<16x16xf32>
    %c2_i32 = arith.constant 2 : i32
    %9 = arith.addi %0, %c2_i32 : i32
    %c0_3 = arith.constant 0 : index
    %10 = arith.index_cast %9 : i32 to index
    %c0_4 = arith.constant 0 : index
    %11 = vector.load %arg2[%c0_3, %10, %c0_4] : memref<1x24x16xf32, #tpu.memory_space<vmem>>, vector<1x16x16xf32>
    %12 = vector.shape_cast %11 : vector<1x16x16xf32> to vector<16x16xf32>
    %c3_i32 = arith.constant 3 : i32
    %13 = arith.addi %0, %c3_i32 : i32
    %c0_5 = arith.constant 0 : index
    %14 = arith.index_cast %13 : i32 to index
    %c0_6 = arith.constant 0 : index
    %15 = vector.load %arg2[%c0_5, %14, %c0_6] : memref<1x24x16xf32, #tpu.memory_space<vmem>>, vector<1x16x16xf32>
    %16 = vector.shape_cast %15 : vector<1x16x16xf32> to vector<16x16xf32>
    %17 = tpu.concatenate %4, %8, %12, %16 in 1 : vector<16x16xf32>, vector<16x16xf32>, vector<16x16xf32>, vector<16x16xf32> -> vector<16x64xf32>
    %18 = arith.truncf %17 : vector<16x64xf32> to vector<16x64xbf16>
    %c0_7 = arith.constant 0 : index
    %c0_8 = arith.constant 0 : index
    %19 = vector.load %arg3[%c0_7, %c0_8] : memref<64x256xbf16, #tpu.memory_space<vmem>>, vector<64x256xbf16>
    %cst = arith.constant dense<0.000000e+00> : vector<16x256xf32>
    %20 = tpu.matmul %18, %19, %cst {dimension_numbers = #tpu.dot_dimension_numbers<[1], [0], [0], [1], [0, 0, 1, 1], [], []>} : vector<16x64xbf16>, vector<64x256xbf16>, vector<16x256xf32> -> vector<16x256xf32>
    %21 = tpu.iota {dimensions = array<i32: 0>} : vector<16x1xi32>
    %22 = vector.broadcast %0 : i32 to vector<16x1xi32>
    %23 = arith.addi %22, %21 : vector<16x1xi32>
    %c9_i32 = arith.constant 9 : i32
    %24 = vector.broadcast %c9_i32 : i32 to vector<16x1xi32>
    %25 = arith.cmpi slt, %23, %24 : vector<16x1xi32>
    %cst_9 = arith.constant 0.000000e+00 : f32
    %26 = vector.shape_cast %25 : vector<16x1xi1> to vector<16x1xi1>
    %27 = vector.broadcast %26 : vector<16x1xi1> to vector<16x256xi1>
    %28 = vector.broadcast %cst_9 : f32 to vector<16x256xf32>
    %29 = arith.select %27, %20, %28 : vector<16x256xi1>, vector<16x256xf32>
    %30 = vector.extract_strided_slice %29 {offsets = [0, 0], sizes = [16, 128], strides = [1, 1]} : vector<16x256xf32> to vector<16x128xf32>
    %31 = vector.extract_strided_slice %29 {offsets = [0, 128], sizes = [16, 128], strides = [1, 1]} : vector<16x256xf32> to vector<16x128xf32>
    %32 = arith.mulf %30, %30 : vector<16x128xf32>
    %33 = arith.mulf %31, %31 : vector<16x128xf32>
    %34 = arith.addf %32, %33 : vector<16x128xf32>
    %cst_10 = arith.constant 9.99999991E-38 : f32
    %35 = vector.broadcast %cst_10 : f32 to vector<16x128xf32>
    %36 = arith.maximumf %34, %35 : vector<16x128xf32>
    %37 = math.log %36 : vector<16x128xf32>
    %cst_11 = arith.constant 0.434294492 : f32
    %38 = vector.broadcast %cst_11 : f32 to vector<16x128xf32>
    %39 = arith.mulf %37, %38 : vector<16x128xf32>
    %cst_12 = arith.constant 1.000000e+01 : f32
    %40 = vector.broadcast %cst_12 : f32 to vector<16x128xf32>
    %41 = arith.mulf %40, %39 : vector<16x128xf32>
    %42 = arith.truncf %41 : vector<16x128xf32> to vector<16x128xbf16>
    %c0_13 = arith.constant 0 : index
    %c0_14 = arith.constant 0 : index
    %43 = vector.load %arg4[%c0_13, %c0_14] : memref<128x128xbf16, #tpu.memory_space<vmem>>, vector<128x128xbf16>
    %cst_15 = arith.constant dense<0.000000e+00> : vector<16x128xf32>
    %44 = tpu.matmul %42, %43, %cst_15 {dimension_numbers = #tpu.dot_dimension_numbers<[1], [0], [0], [1], [0, 0, 1, 1], [], []>} : vector<16x128xbf16>, vector<128x128xbf16>, vector<16x128xf32> -> vector<16x128xf32>
    %c0_16 = arith.constant 0 : index
    %c0_17 = arith.constant 0 : index
    %45 = vector.load %arg5[%c0_16, %c0_17] : memref<1x128xf32, #tpu.memory_space<vmem>>, vector<1x128xf32>
    %46 = vector.broadcast %45 : vector<1x128xf32> to vector<16x128xf32>
    %47 = arith.addf %44, %46 : vector<16x128xf32>
    %48 = math.tanh %47 : vector<16x128xf32>
    %c0_18 = arith.constant 0 : index
    %c0_19 = arith.constant 0 : index
    %c0_20 = arith.constant 0 : index
    %49 = vector.load %arg10[%c0_18, %c0_19, %c0_20] : memref<1x16x128xf32, #tpu.memory_space<vmem>>, vector<1x16x128xf32>
    %50 = vector.shape_cast %49 : vector<1x16x128xf32> to vector<16x128xf32>
    %51 = vector.shape_cast %48 : vector<16x128xf32> to vector<1x16x128xf32>
    tpu.vector_store %arg10[%c0_18, %c0_19, %c0_20], %51 {strides = array<i32>} : memref<1x16x128xf32, #tpu.memory_space<vmem>>, vector<1x16x128xf32>,
    %c0_21 = arith.constant 0 : index
    %c0_22 = arith.constant 0 : index
    %52 = vector.load %arg6[%c0_21, %c0_22] : memref<128x512xbf16, #tpu.memory_space<vmem>>, vector<128x512xbf16>
    %cst_23 = arith.constant dense<0.000000e+00> : vector<16x512xf32>
    %53 = tpu.matmul %42, %52, %cst_23 {dimension_numbers = #tpu.dot_dimension_numbers<[1], [0], [0], [1], [0, 0, 1, 1], [], []>} : vector<16x128xbf16>, vector<128x512xbf16>, vector<16x512xf32> -> vector<16x512xf32>
    %c0_24 = arith.constant 0 : index
    %c0_25 = arith.constant 0 : index
    %54 = vector.load %arg7[%c0_24, %c0_25] : memref<1x512xf32, #tpu.memory_space<vmem>>, vector<1x512xf32>
    %55 = vector.broadcast %54 : vector<1x512xf32> to vector<16x512xf32>
    %56 = arith.addf %53, %55 : vector<16x512xf32>
    %57 = math.tanh %56 : vector<16x512xf32>
    %c0_26 = arith.constant 0 : index
    %c0_27 = arith.constant 0 : index
    %c0_28 = arith.constant 0 : index
    %58 = vector.load %arg11[%c0_26, %c0_27, %c0_28] : memref<1x16x512xf32, #tpu.memory_space<vmem>>, vector<1x16x512xf32>
    %59 = vector.shape_cast %58 : vector<1x16x512xf32> to vector<16x512xf32>
    %60 = vector.shape_cast %57 : vector<16x512xf32> to vector<1x16x512xf32>
    tpu.vector_store %arg11[%c0_26, %c0_27, %c0_28], %60 {strides = array<i32>} : memref<1x16x512xf32, #tpu.memory_space<vmem>>, vector<1x16x512xf32>,
    %61 = vector.extract_strided_slice %57 {offsets = [0, 0], sizes = [16, 128], strides = [1, 1]} : vector<16x512xf32> to vector<16x128xf32>
    %62 = vector.extract_strided_slice %57 {offsets = [0, 128], sizes = [16, 128], strides = [1, 1]} : vector<16x512xf32> to vector<16x128xf32>
    %63 = arith.mulf %61, %30 : vector<16x128xf32>
    %64 = arith.mulf %62, %31 : vector<16x128xf32>
    %65 = arith.subf %63, %64 : vector<16x128xf32>
    %66 = arith.truncf %65 : vector<16x128xf32> to vector<16x128xbf16>
    %67 = arith.mulf %61, %31 : vector<16x128xf32>
    %68 = arith.mulf %62, %30 : vector<16x128xf32>
    %69 = arith.addf %67, %68 : vector<16x128xf32>
    %70 = arith.truncf %69 : vector<16x128xf32> to vector<16x128xbf16>
    %c0_29 = arith.constant 0 : index
    %c0_30 = arith.constant 0 : index
    %71 = vector.load %arg8[%c0_29, %c0_30] : memref<128x64xbf16, #tpu.memory_space<vmem>>, vector<128x64xbf16>
    %cst_31 = arith.constant dense<0.000000e+00> : vector<16x64xf32>
    %72 = tpu.matmul %66, %71, %cst_31 {dimension_numbers = #tpu.dot_dimension_numbers<[1], [0], [0], [1], [0, 0, 1, 1], [], []>} : vector<16x128xbf16>, vector<128x64xbf16>, vector<16x64xf32> -> vector<16x64xf32>
    %c0_32 = arith.constant 0 : index
    %c0_33 = arith.constant 0 : index
    %73 = vector.load %arg9[%c0_32, %c0_33] : memref<128x64xbf16, #tpu.memory_space<vmem>>, vector<128x64xbf16>
    %cst_34 = arith.constant dense<0.000000e+00> : vector<16x64xf32>
    %74 = tpu.matmul %70, %73, %cst_34 {dimension_numbers = #tpu.dot_dimension_numbers<[1], [0], [0], [1], [0, 0, 1, 1], [], []>} : vector<16x128xbf16>, vector<128x64xbf16>, vector<16x64xf32> -> vector<16x64xf32>
    %75 = arith.addf %72, %74 : vector<16x64xf32>
    %76 = arith.truncf %75 : vector<16x64xf32> to vector<16x64xbf16>
    %c0_35 = arith.constant 0 : index
    %c0_36 = arith.constant 0 : index
    %c0_37 = arith.constant 0 : index
    %c0_38 = arith.constant 0 : index
    %77 = vector.load %arg12[%c0_35, %c0_36, %c0_37, %c0_38] : memref<1x2x16x64xbf16, #tpu.memory_space<vmem>>, vector<1x1x16x64xbf16>
    %78 = vector.shape_cast %77 : vector<1x1x16x64xbf16> to vector<16x64xbf16>
    %79 = vector.shape_cast %76 : vector<16x64xbf16> to vector<1x1x16x64xbf16>
    tpu.vector_store %arg12[%c0_35, %c0_36, %c0_37, %c0_38], %79 {strides = array<i32>} : memref<1x2x16x64xbf16, #tpu.memory_space<vmem>>, vector<1x1x16x64xbf16>,
    %80 = vector.extract_strided_slice %57 {offsets = [0, 256], sizes = [16, 128], strides = [1, 1]} : vector<16x512xf32> to vector<16x128xf32>
    %81 = vector.extract_strided_slice %57 {offsets = [0, 384], sizes = [16, 128], strides = [1, 1]} : vector<16x512xf32> to vector<16x128xf32>
    %82 = arith.mulf %80, %30 : vector<16x128xf32>
    %83 = arith.mulf %81, %31 : vector<16x128xf32>
    %84 = arith.subf %82, %83 : vector<16x128xf32>
    %85 = arith.truncf %84 : vector<16x128xf32> to vector<16x128xbf16>
    %86 = arith.mulf %80, %31 : vector<16x128xf32>
    %87 = arith.mulf %81, %30 : vector<16x128xf32>
    %88 = arith.addf %86, %87 : vector<16x128xf32>
    %89 = arith.truncf %88 : vector<16x128xf32> to vector<16x128xbf16>
    %c0_39 = arith.constant 0 : index
    %c0_40 = arith.constant 0 : index
    %90 = vector.load %arg8[%c0_39, %c0_40] : memref<128x64xbf16, #tpu.memory_space<vmem>>, vector<128x64xbf16>
    %cst_41 = arith.constant dense<0.000000e+00> : vector<16x64xf32>
    %91 = tpu.matmul %85, %90, %cst_41 {dimension_numbers = #tpu.dot_dimension_numbers<[1], [0], [0], [1], [0, 0, 1, 1], [], []>} : vector<16x128xbf16>, vector<128x64xbf16>, vector<16x64xf32> -> vector<16x64xf32>
    %c0_42 = arith.constant 0 : index
    %c0_43 = arith.constant 0 : index
    %92 = vector.load %arg9[%c0_42, %c0_43] : memref<128x64xbf16, #tpu.memory_space<vmem>>, vector<128x64xbf16>
    %cst_44 = arith.constant dense<0.000000e+00> : vector<16x64xf32>
    %93 = tpu.matmul %89, %92, %cst_44 {dimension_numbers = #tpu.dot_dimension_numbers<[1], [0], [0], [1], [0, 0, 1, 1], [], []>} : vector<16x128xbf16>, vector<128x64xbf16>, vector<16x64xf32> -> vector<16x64xf32>
    %94 = arith.addf %91, %93 : vector<16x64xf32>
    %95 = arith.truncf %94 : vector<16x64xf32> to vector<16x64xbf16>
    %c0_45 = arith.constant 0 : index
    %c1 = arith.constant 1 : index
    %c0_46 = arith.constant 0 : index
    %c0_47 = arith.constant 0 : index
    %96 = vector.load %arg12[%c0_45, %c1, %c0_46, %c0_47] : memref<1x2x16x64xbf16, #tpu.memory_space<vmem>>, vector<1x1x16x64xbf16>
    %97 = vector.shape_cast %96 : vector<1x1x16x64xbf16> to vector<16x64xbf16>
    %98 = vector.shape_cast %95 : vector<16x64xbf16> to vector<1x1x16x64xbf16>
    tpu.vector_store %arg12[%c0_45, %c1, %c0_46, %c0_47], %98 {strides = array<i32>} : memref<1x2x16x64xbf16, #tpu.memory_space<vmem>>, vector<1x1x16x64xbf16>,
    return
  }
  func.func @transform_0(%arg0: i32, %arg1: i32) -> (i32, i32, i32) {
    %c0_i32 = arith.constant 0 : i32
    %c0_i32_0 = arith.constant 0 : i32
    %c0_i32_1 = arith.constant 0 : i32
    return %arg0, %c0_i32, %c0_i32_0 : i32, i32, i32
  }
  func.func @transform_1(%arg0: i32, %arg1: i32) -> (i32, i32) {
    %c0_i32 = arith.constant 0 : i32
    %c0_i32_0 = arith.constant 0 : i32
    %c0_i32_1 = arith.constant 0 : i32
    return %c0_i32, %c0_i32_0 : i32, i32
  }
  func.func @transform_2(%arg0: i32, %arg1: i32) -> (i32, i32) {
    %c0_i32 = arith.constant 0 : i32
    %c0_i32_0 = arith.constant 0 : i32
    %c0_i32_1 = arith.constant 0 : i32
    return %c0_i32, %c0_i32_0 : i32, i32
  }
  func.func @transform_3(%arg0: i32, %arg1: i32) -> (i32, i32) {
    %c0_i32 = arith.constant 0 : i32
    %c0_i32_0 = arith.constant 0 : i32
    %c0_i32_1 = arith.constant 0 : i32
    return %c0_i32, %c0_i32_0 : i32, i32
  }
  func.func @transform_4(%arg0: i32, %arg1: i32) -> (i32, i32) {
    %c0_i32 = arith.constant 0 : i32
    %c0_i32_0 = arith.constant 0 : i32
    %c0_i32_1 = arith.constant 0 : i32
    return %c0_i32, %c0_i32_0 : i32, i32
  }
  func.func @transform_5(%arg0: i32, %arg1: i32) -> (i32, i32) {
    %c0_i32 = arith.constant 0 : i32
    %c0_i32_0 = arith.constant 0 : i32
    %c0_i32_1 = arith.constant 0 : i32
    return %c0_i32, %c0_i32_0 : i32, i32
  }
  func.func @transform_6(%arg0: i32, %arg1: i32) -> (i32, i32) {
    %c0_i32 = arith.constant 0 : i32
    %c0_i32_0 = arith.constant 0 : i32
    %c0_i32_1 = arith.constant 0 : i32
    return %c0_i32, %c0_i32_0 : i32, i32
  }
  func.func @transform_7(%arg0: i32, %arg1: i32) -> (i32, i32) {
    %c0_i32 = arith.constant 0 : i32
    %c0_i32_0 = arith.constant 0 : i32
    %c0_i32_1 = arith.constant 0 : i32
    return %c0_i32, %c0_i32_0 : i32, i32
  }
  func.func @transform_8(%arg0: i32, %arg1: i32) -> (i32, i32, i32) {
    %c0_i32 = arith.constant 0 : i32
    %c0_i32_0 = arith.constant 0 : i32
    return %arg0, %arg1, %c0_i32 : i32, i32, i32
  }
  func.func @transform_9(%arg0: i32, %arg1: i32) -> (i32, i32, i32) {
    %c0_i32 = arith.constant 0 : i32
    %c0_i32_0 = arith.constant 0 : i32
    return %arg0, %arg1, %c0_i32 : i32, i32, i32
  }
  func.func @transform_10(%arg0: i32, %arg1: i32) -> (i32, i32, i32, i32) {
    %c0_i32 = arith.constant 0 : i32
    %c0_i32_0 = arith.constant 0 : i32
    %c0_i32_1 = arith.constant 0 : i32
    return %arg0, %c0_i32, %arg1, %c0_i32_0 : i32, i32, i32, i32
  }
}

</mosaic_0001>

<bundles_post_ra>
// kernel: tpu_custom_call.1
= control target key start
LH: loop header
LB: loop body
LE: loop exit
PB: predicated region body
PF: predicated region fallthrough
CT: control target
= control target key end

     0   :  { %s3211_s0 = inlined_call_operand.vmem [shape: f32[2,24,16], index: 0, kind: input, shape index: {}]   ;;  %s3212_s1 = inlined_call_operand.hbm [shape: bf16[64,256], index: 1, kind: input, shape index: {}]   ;;  %s3213_s2 = inlined_call_operand.hbm [shape: bf16[128,128], index: 2, kind: input, shape index: {}]   ;;  %s3214_s3 = inlined_call_operand.vmem [shape: f32[1,128], index: 3, kind: input, shape index: {}]   ;;  %s3215_s4 = inlined_call_operand.vmem [shape: bf16[128,512], index: 4, kind: input, shape index: {}]   ;;  %s3216_s5 = inlined_call_operand.hbm [shape: f32[1,512], index: 5, kind: input, shape index: {}]   ;;  %s3217_s6 = inlined_call_operand.vmem [shape: bf16[128,64], index: 6, kind: input, shape index: {}]   ;;  %s3218_s7 = inlined_call_operand.vmem [shape: bf16[128,64], index: 7, kind: input, shape index: {}]   ;;  %s3219_s8 = inlined_call_operand.hbm [shape: f32[2,16,128], index: 8, kind: output, shape index: {0}]   ;;  %s3220_s9 = inlined_call_operand.hbm [shape: f32[2,16,512], index: 9, kind: output, shape index: {1}]   ;;  %s3221_s10 = inlined_call_operand.hbm [shape: bf16[2,2,16,64], index: 10, kind: output, shape index: {2}]  }
   0x1   :  { %3233 = sst [smem:[#allocation23_spill]] %s3213_s2 }
   0x2   :  { %16 = vsyncpa [#allocation3], 0 }
   0x3   :  { %17 = vsyncpa [#allocation6], 0 }
   0x4   :  { %18 = vsyncpa [#allocation4], 0 }
   0x5   :  { %20 = vsyncpa [#allocation4 + $0x1], 0 }
   0x6   :  { %21 = vsyncpa [#allocation10], 0 }
   0x7   :  { %23 = vsyncpa [#allocation10 + $0x1], 0  ;;  %s2604_s13 = smov 0   ;;  %s2606_s14 = smov 0  }
   0x8   :  { %s2608_s15 = smov 0   ;;  %s2610_s16 = smov 0  }
   0x9   :  { %s2612_s17 = smov 0   ;;  %s2614_s18 = smov 0  }
   0xa LB: > { %3234 = sst [smem:[#allocation16_spill]] %s2506_s13  ;;  %s2635_s19 = sadd.s32 4294967295, %s2526_s18   ;;  %s2526_s18 = sphi %s2614_s18, %s29_s18   ;;  %s2522_s17 = sphi %s2612_s17, %s3261_s17   ;;  %s2518_s16 = sphi %s2610_s16, %s3260_s16   ;;  %s2514_s15 = sphi %s2608_s15, %s3259_s15   ;;  %s2510_s14 = sphi %s2606_s14, %s3263_s14   ;;  %s2506_s13 = sphi %s2604_s13, %s3262_s13  }
   0xb   : > { %3235 = sst [smem:[#allocation17_spill]] %s2514_s15  ;;  %s3222_s20 = sadd.s32 4294967294, %s2526_s18  }
   0xc   : > { %3236 = sst [smem:[#allocation18_spill]] %s2522_s17  ;;  %s41_s21 = sadd.s32 1, %s2522_s17 }
   0xd   : > { %3237 = sst [smem:[#allocation19_spill]] %s2526_s18  ;;  %s223_s22 = sadd.s32 1, %s2514_s15 }
   0xe   : > { %p43_p0 = scmp.ge.s32.totalorder %s41_s21, 2  ;;  %p233_p1 = scmp.ne.s32.totalorder %s2514_s15, %s2510_s14 }
   0xf   : > { %p234_p2 = scmp.eq.s32.totalorder %s2635_s19, 1  ;;  %p239_p3 = scmp.ne.s32.totalorder %s2510_s14, %s2506_s13 }
  0x10   : > { %s3265_s21 = smov (%p43_p0, %s41_s21), 0  ;;  %p240_p5 = scmp.eq.s32.totalorder %s3222_s20, 1 }
  0x11   : > { %3238 = sst [smem:[#allocation20_spill]] %s3265_s21  ;;  %p2647_p4 = por %p234_p2, %p233_p1 }
  0x12   : > { %s218_s24 = ssub.s32 %s2522_s17, %s3265_s21  ;;  %p1767_p6 = scmp.ge.s32.totalorder %s2526_s18, 1 }
  0x13   : > { %s3239_s23 = scalar_select %p2647_p4, 1, 0 }
  0x14   : > { %p221_p7 = scmp.eq.s32.totalorder %s218_s24, 0  ;;  %p2656_p8 = por %p240_p5, %p239_p3 }
  0x15   : > { %p303_p9 = scmp.lt.s32.totalorder %s2526_s18, 3  ;;  %p3226_p11 = scmp.eq.s32.totalorder %s2635_s19, 0 }
  0x16   : > { %s3240_s25 = scalar_select %p2656_p8, 1, 0 }
  0x17   : > { %s2662_s26 = scalar_select %p221_p7, %s2514_s15, %s223_s22  }
  0x18   : > { %3241 = sst [smem:[#allocation21_spill]] %s3240_s25  ;;  %p2664_p10 = pnand %p1767_p6, %p303_p9 }
  0x19   : > { %3242 = sst [smem:[#allocation22_spill]] %s2662_s26  ;;  %s2528_s28 = smov [#allocation5]  }
  0x1a   : > { %s3243_s27 = scalar_select %p2664_p10, 1, 0 }
  0x1b   : > { %p2064_p12 = pneg %p2664_p10  ;;  %s328_s29 = sshll.u32 %s2528_s28, 4  ;;  %s329_s29 = int_to_ptr.vmem [resolvable:$true] %s328_s29 }
  0x1c   : > { %s2529_s11 = smov [#allocation2]   ;;  %s3245_s2 = sld [smem:[#allocation23_spill]] }
  0x1d   : > { %p2673_p13 = pnand %p3226_p11, %p2064_p12  ;;  %s315_s12 = sshll.u32 %s2529_s11, 4  ;;  %s316_s12 = int_to_ptr.vmem [resolvable:$true] %s315_s12 }
  0x1f   : > { %p2685_p1 = pneg %p2673_p13 }
  0x22   : > { %s2296_s20 = scalar_lea.hbm %s3245_s2, 1024 }
  0x23   : > { %p2297_p0 = scmp.ne.s32.totalorder %s3245_s2, %s2296_s20  ;;  %p2303_p5 = scmp.lt.u32.totalorder %s2296_s20, %s3245_s2 }
  0x25   : > { %p2299_p2 = pnand %p2685_p1, %p2297_p0 }
  0x27   : > { %p2300_p3 = pneg %p2299_p2 }
  0x29   : > { %p2305_p6 = pnand %p2303_p5, %p2300_p3 }
  0x2b   : > { %2308 = shalt.err (!%p2305_p6)
}
  0x2c   : > { %s2309_s11 = scalar_lea.vmem %s329_s29, 1024  ;;  %p2317_p11 = scmp.lt.s32.totalorder %s329_s29, %s329_s29 }
  0x2d   : > { %p2310_p7 = scmp.ne.s32.totalorder %s329_s29, %s2309_s11  ;;  %p2318_p8 = scmp.lt.s32.totalorder %s2309_s11, %s2309_s11 }
  0x2f   : > { %p2312_p9 = pnand %p2310_p7, %p2685_p1  ;;  %p2319_p4 = por %p2318_p8, %p2317_p11 }
  0x31   : > { %p2313_p12 = pneg %p2312_p9 }
  0x33   : > { %p2320_p10 = pnand %p2319_p4, %p2313_p12 }
  0x35   : > { %2323 = shalt.err (!%p2320_p10)
}
  0x36   : > { %s2530_s17 = smov 64   ;;  %s2531_s21 = smov 4  }
  0x37   : > { %2070 = dma.hbm_to_vmem [thread:$0]  (!%p2673_p13), %s3245_s2, 1024, %s329_s29, [#allocation6], %s2530_s17, %s2530_s17, %s2531_s21  }
  0x38   : > { %s2324_s24 = scalar_lea.hbm %s3212_s1, 1024 }
  0x39   : > { %p2325_p8 = scmp.ne.s32.totalorder %s3212_s1, %s2324_s24  ;;  %p2331_p11 = scmp.lt.u32.totalorder %s2324_s24, %s3212_s1 }
  0x3b   : > { %p2327_p4 = pnand %p2325_p8, %p2685_p1 }
  0x3d   : > { %p2328_p10 = pneg %p2327_p4 }
  0x3f   : > { %p2333_p0 = pnand %p2331_p11, %p2328_p10 }
  0x41   : > { %2336 = shalt.err (!%p2333_p0)
}
  0x42   : > { %s2337_s15 = scalar_lea.vmem %s316_s12, 1024  ;;  %p2345_p6 = scmp.lt.s32.totalorder %s316_s12, %s316_s12 }
  0x43   : > { %p2338_p2 = scmp.ne.s32.totalorder %s316_s12, %s2337_s15  ;;  %p2346_p7 = scmp.lt.s32.totalorder %s2337_s15, %s2337_s15 }
  0x45   : > { %p2340_p3 = pnand %p2338_p2, %p2685_p1  ;;  %p2347_p9 = por %p2346_p7, %p2345_p6 }
  0x47   : > { %p2341_p5 = pneg %p2340_p3 }
  0x49   : > { %p2348_p12 = pnand %p2347_p9, %p2341_p5 }
  0x4b   : > { %2351 = shalt.err (!%p2348_p12)
}
  0x4c   : > { %s2532_s13 = smov 128   ;;  %s2533_s25 = smov 8  }
  0x4d   : > { %2067 = dma.hbm_to_vmem [thread:$0]  (!%p2673_p13), %s3212_s1, 1024, %s316_s12, [#allocation3], %s2532_s13, %s2532_s13, %s2533_s25  }
  0x4e   : > { %s2534_s17 = smov [#allocation7]   ;;  %s2352_s22 = scalar_lea.hbm %s3216_s5, 64 }
  0x4f   : > { %s348_s21 = sshll.u32 %s2534_s17, 4  ;;  %p2353_p8 = scmp.ne.s32.totalorder %s3216_s5, %s2352_s22  ;;  %s349_s21 = int_to_ptr.vmem [resolvable:$true] %s348_s21 }
  0x50   : > { %p2359_p11 = scmp.lt.u32.totalorder %s2352_s22, %s3216_s5 }
  0x51   : > { %p2355_p4 = pnand %p2353_p8, %p2685_p1 }
  0x53   : > { %p2356_p10 = pneg %p2355_p4 }
  0x55   : > { %p2361_p0 = pnand %p2359_p11, %p2356_p10 }
  0x57   : > { %2364 = shalt.err (!%p2361_p0)
}
  0x58   : > { %s2365_s12 = scalar_lea.vmem %s349_s21, 64  ;;  %p2373_p6 = scmp.lt.s32.totalorder %s349_s21, %s349_s21 }
  0x59   : > { %p2366_p2 = scmp.ne.s32.totalorder %s349_s21, %s2365_s12  ;;  %p2374_p7 = scmp.lt.s32.totalorder %s2365_s12, %s2365_s12 }
  0x5b   : > { %p2368_p3 = pnand %p2366_p2, %p2685_p1  ;;  %p2375_p9 = por %p2374_p7, %p2373_p6 }
  0x5d   : > { %p2369_p5 = pneg %p2368_p3 }
  0x5f   : > { %p2376_p12 = pnand %p2375_p9, %p2369_p5 }
  0x61   : > { %2379 = shalt.err (!%p2376_p12)
}
  0x62   : > { %2073 = dma.hbm_to_vmem [thread:$0]  (!%p2673_p13), %s3216_s5, 64, %s349_s21, [#allocation6]  }
  0x63   : > { %p3247_p8 = scmp.ne.s32.totalorder %s3243_s27, 0 }
  0x64   : > { %p3248_p4 = scmp.eq.s32.totalorder (!%p3247_p8), %s2635_s19, 0 }
  0x65   : > { %375 = sbr.rel (%p3247_p8) target bundleno = 1018 (0x3fa), region = 52 }
  0x6c   : > { %2489 = dma.done.wait (%p3248_p4), [#allocation3], 1024   ;;  %p3249_p1 = pmov %p3248_p4 }
  0x6e   : > { %2491 = vsyncadd (%p3249_p1), [#allocation3], 4294966272  ;;  %p3250_p10 = pmov %p3249_p1 }
  0x6f   : > { %p3251_p11 = pmov %p3249_p1 }
  0x70   : > { %2493 = dma.done.wait (%p3250_p10), [#allocation6], 1088  }
  0x71   : > { %2495 = vsyncadd (%p3251_p11), [#allocation6], 4294966208  ;;  %p431_p0 = scmp.lt.s32.totalorder %s2518_s16, 1  ;;  %v2535_v0 = vmov 0   ;;  %v2536_v8 = vmov 0.0   ;;  %s2537_s29 = smov 16   ;;  %v585_v62 = vlaneseq }
  0x72   : > { %574 = vmatprep.mubr.bf16.mxu0 %v2535_v0  ;;  %1937 = vmatprep.subr.bf16.mxu1 %v2536_v8  ;;  %v2172_v10 = vld [vmem:[#allocation2 + $0x4] ss:$8 sps:$4 sm:$0xff]   ;;  %v2174_v12 = vld [vmem:[#allocation2] ss:$8 sps:$4 sm:$0xff]   ;;  %s2538_s17 = smov 48   ;;  %s2539_s21 = smov 32  }
  0x73   : > { %s432_s2 = scalar_select %p431_p0, %s2518_s16, 1  ;;  %542 = vmatprep.subr.bf16.mxu0 %v2172_v10  ;;  %v2175_v13 = vld [vmem:[#allocation2 + $0x14] ss:$8 sps:$4 sm:$0xff]   ;;  %v2177_v14 = vld [vmem:[#allocation2 + $0x10] ss:$8 sps:$4 sm:$0xff]   ;;  %v2184_v16 = vld [vmem:[#allocation5] sm:$0xff]  }
  0x74   : > { %543 = vmatpush1.bf16.msra.mxu0 %v2174_v12  ;;  %v2178_v15 = vld [vmem:[#allocation2 + $0x24] ss:$8 sps:$4 sm:$0xff]   ;;  %v2180_v17 = vld [vmem:[#allocation2 + $0x20] ss:$8 sps:$4 sm:$0xff]   ;;  %v2181_v18 = vld [vmem:[#allocation2 + $0x34] ss:$8 sps:$4 sm:$0xff]   ;;  %1938 = vmatpush3.bf16.msra.mxu1 %v2184_v16 }
  0x75   : > { %s2045_s30 = smul.u32 24, %s432_s2  ;;  %544 = vmatprep.subr.bf16.mxu0 %v2175_v13  ;;  %v2183_v19 = vld [vmem:[#allocation2 + $0x30] ss:$8 sps:$4 sm:$0xff]   ;;  %1939 = vmatprep.subr.bf16.mxu1 %v2536_v8  ;;  %v2187_v20 = vld [vmem:[%s3215_s4 + $0x4] ss:$16 sps:$4 sm:$0xff]   ;;  %vm480_vm0 = vcmask 130048  }
  0x76   : > { %vm483_vm1 = vcmask 261120   ;;  %vm486_vm2 = vcmask 392192   ;;  %vm538_vm3 = vcmask 523264   ;;  %v2185_v38 = vld [vmem:[%s3215_s4] ss:$16 sps:$4 sm:$0xff]   ;;  %v2188_v40 = vld [vmem:[#allocation5 + $0x8] sm:$0xff]  }
  0x77   : > { %s2752_s18 = scalar_lea.vmem %s3211_s0, %s2045_s30  ;;  %v2191_v41 = vld [vmem:[%s3215_s4 + $0x24] ss:$16 sps:$4 sm:$0xff]   ;;  %v2189_v42 = vld [vmem:[%s3215_s4 + $0x20] ss:$16 sps:$4 sm:$0xff]   ;;  %v2196_v46 = vld [vmem:[#allocation5 + $0x18] sm:$0xff]   ;;  %vm2540_vm4 = vmmov 0  }
  0x78   : > { %v1780_v1 = vld [vmem:[%s2752_s18 + $0x1] sm:$0xff]  ;;  %v1781_v2 = vld [vmem:[%s2752_s18 + $0x9] sm:$0xff]  ;;  %545 = vmatpush1.bf16.msra.mxu0 %v2177_v14  ;;  %1940 = vmatpush3.bf16.msra.mxu1 %v2188_v40  ;;  %v2204_v53 = vld [vmem:[#allocation5 + $0x28] sm:$0xff]   ;;  %v2827_v63 = vshrl.u32 %v585_v62, 7  ;;  %s2971_s22 = sand.u32 1, %s2510_s14   ;;  %s1525_s20 = sand.u32 1, %s2635_s19  }
  0x79   : > { %v1782_v3 = vld [vmem:[%s2752_s18 + $0x2] sm:$0xff]  ;;  %v2157_v4 = vpack.i.bf16 %v1781_v2, %v1780_v1  ;;  %v1783_v5 = vld [vmem:[%s2752_s18 + $0xa] sm:$0xff]  ;;  %546 = vmatprep.subr.bf16.mxu0 %v2178_v15  ;;  %1941 = vmatprep.subr.bf16.mxu1 %v2536_v8  ;;  %s1776_s24 = sshll.u32 %s2971_s22, 4  ;;  %s1777_s11 = sshll.u32 %s2971_s22, 6 }
  0x7a   : > { %v1784_v6 = vld [vmem:[%s2752_s18 + $0x3] sm:$0xff]  ;;  %v1785_v7 = vld [vmem:[%s2752_s18 + $0xb] sm:$0xff]  ;;  %v2162_v11 = vpack.i.bf16 %v1783_v5, %v1782_v3  ;;  %1953 = vmatprep.mubr.msk.bf16.mxu1 %vm2540_vm4, %v2536_v8  ;;  %v587_v1 = vadd.s32 8, %v2827_v63  ;;  %s2977_s15 = scalar_lea.vmem [#allocation8], %s1776_s24  ;;  %s2982_s12 = scalar_lea.vmem [#allocation9], %s1777_s11 }
  0x7b   : > { %v2167_v9 = vpack.i.bf16 %v1785_v7, %v1784_v6  ;;  %2158 = vrot.lane.b32.xlu0 %v2157_v4, %s2537_s29  ;;  %v442_v25 = vld [vmem:[%s2752_s18] sm:$0xff]  ;;  %v443_v26 = vld [vmem:[%s2752_s18 + $0x8] sm:$0xff]  ;;  %v2200_v49 = vld [vmem:[#allocation5 + $0x20] sm:$0xff]   ;;  %s1890_s26 = sshll.u32 %s2518_s16, 10  ;;  %s3090_s2 = scalar_lea.sflag [#allocation10], %s1525_s20 }
  0x7c   : > { %547 = vmatpush1.bf16.msra.mxu0 %v2180_v17  ;;  %v2192_v43 = vld [vmem:[#allocation5 + $0x10] sm:$0xff]   ;;  %v2212_v59 = vld [vmem:[#allocation5 + $0x38] sm:$0xff]   ;;  %vm592_vm5 = vcmp.lt.s32.totalorder %v587_v1, 9  ;;  %s3088_s25 = scalar_lea.hbm %s3220_s9, %s1890_s26  ;;  %p3252_p2 = scmp.ne.s32.totalorder %s3239_s23, 0 }
  0x7d   : > { %2168 = vrot.lane.b32.xlu1 %v2167_v9, %s2538_s17  ;;  %548 = vmatprep.subr.bf16.mxu0 %v2181_v18  ;;  %v2195_v44 = vld [vmem:[%s3215_s4 + $0x44] ss:$16 sps:$4 sm:$0xff]   ;;  %v2193_v45 = vld [vmem:[%s3215_s4 + $0x40] ss:$16 sps:$4 sm:$0xff]   ;;  %v2218_v61 = vld [vmem:[%s3215_s4 + $0xc] ss:$16 sps:$4 sm:$0xff]  }
  0x7e   : > { %1942 = vmatpush3.bf16.msra.mxu1 %v2192_v43  ;;  %v2199_v47 = vld [vmem:[%s3215_s4 + $0x64] ss:$16 sps:$4 sm:$0xff]   ;;  %v2197_v48 = vld [vmem:[%s3215_s4 + $0x60] ss:$16 sps:$4 sm:$0xff]   ;;  %v2234_v40 = vld [vmem:[%s3215_s4 + $0xc8] ss:$16 sps:$4 sm:$0xff]  }
  0x7f   : > { %2163 = vrot.lane.b32.xlu0 %v2162_v11, %s2539_s21  ;;  %1943 = vmatprep.subr.bf16.mxu1 %v2536_v8  ;;  %v2203_v50 = vld [vmem:[%s3215_s4 + $0x84] ss:$16 sps:$4 sm:$0xff]   ;;  %v2201_v51 = vld [vmem:[%s3215_s4 + $0x80] ss:$16 sps:$4 sm:$0xff]   ;;  %v2243_v43 = vld [vmem:[%s3218_s7 + $0x18] sm:$0xff]   ;;  %s1565_s17 = sshll.u32 %s2982_s12, 4  ;;  %s3081_s17 = int_to_ptr.vmem [resolvable:$true] %s1565_s17 }
  0x80   : > { %549 = vmatpush1.bf16.msra.mxu0 %v2183_v19  ;;  %v2207_v52 = vld [vmem:[%s3215_s4 + $0xa4] ss:$16 sps:$4 sm:$0xff]   ;;  %v2205_v54 = vld [vmem:[%s3215_s4 + $0xa0] ss:$16 sps:$4 sm:$0xff]   ;;  %s2380_s30 = scalar_lea.vmem %s3081_s17, 1024 }
  0x81   : > { %948 = vmatprep.subr.bf16.mxu0 %v2187_v20  ;;  %v2211_v55 = vld [vmem:[%s3215_s4 + $0xc4] ss:$16 sps:$4 sm:$0xff]   ;;  %v2209_v57 = vld [vmem:[%s3215_s4 + $0xc0] ss:$16 sps:$4 sm:$0xff]   ;;  %p2381_p13 = scmp.ne.s32.totalorder %s3081_s17, %s2380_s30 }
  0x82   : > { %1944 = vmatpush3.bf16.msra.mxu1 %v2196_v46  ;;  %v2208_v56 = vld [vmem:[#allocation5 + $0x30] sm:$0xff]  }
  0x83   : > { %1945 = vmatprep.subr.bf16.mxu1 %v2536_v8  ;;  %v2215_v58 = vld [vmem:[%s3215_s4 + $0xe4] ss:$16 sps:$4 sm:$0xff]   ;;  %v2213_v60 = vld [vmem:[%s3215_s4 + $0xe0] ss:$16 sps:$4 sm:$0xff]   ;;  %p2382_p3 = pnand %p2381_p13, %p3252_p2 }
  0x84   : > { %v2248_v46 = vld [vmem:[%s3218_s7] sm:$0xff]  }
  0x85   : > { %p2383_p5 = pneg %p2382_p3 }
  0x86   : > { %1946 = vmatpush3.bf16.msra.mxu1 %v2200_v49  ;;  %v2250_v49 = vld [vmem:[%s3218_s7 + $0x8] sm:$0xff]  }
  0x87   : > { %1947 = vmatprep.subr.bf16.mxu1 %v2536_v8 }
  0x8a   : > { %1948 = vmatpush3.bf16.msra.mxu1 %v2204_v53  ;;  %v2258_v53 = vld [vmem:[%s3218_s7 + $0x28] sm:$0xff]  }
  0x8b   : > { %1949 = vmatprep.subr.bf16.mxu1 %v2536_v8 }
  0x8e   : > { %1950 = vmatpush3.bf16.msra.mxu1 %v2208_v56  ;;  %v770_v56 = vsub.s32 0, %v2827_v63 }
  0x8f   : > { %1951 = vmatprep.subr.bf16.mxu1 %v2536_v8 }
  0x92   : > { %1952 = vmatpush3.bf16.msra.mxu1 %v2212_v59 }
  0x93   : > { %991 = vmatprep.subr.bf16.mxu1 %v2218_v61 }
  0xed   : > { %v2159_v21 = vpop.permute.xlu0 %2158 }
  0xee   : > { %v2161_v23 = vunpack.i.h.bf16 %v2159_v21  ;;  %v2160_v24 = vunpack.i.l.bf16 %v2159_v21 }
  0xef   : > { %v2169_v22 = vpop.permute.xlu1 %2168 }
  0xf0   : > { %v2171_v28 = vunpack.i.h.bf16 %v2169_v22  ;;  %v2170_v29 = vunpack.i.l.bf16 %v2169_v22  ;;  %v481_v32 = vsel %vm480_vm0, %v442_v25, %v2160_v24  ;;  %v482_v33 = vsel %vm480_vm0, %v443_v26, %v2161_v23  ;;  %v2216_v25 = vld [vmem:[%s3215_s4 + $0x8] ss:$16 sps:$4 sm:$0xff]  }
  0xf1   : > { %v2164_v27 = vpop.permute.xlu0 %2163 }
  0xf2   : > { %v2166_v30 = vunpack.i.h.bf16 %v2164_v27  ;;  %v2165_v31 = vunpack.i.l.bf16 %v2164_v27  ;;  %v2221_v27 = vld [vmem:[%s3215_s4 + $0x2c] ss:$16 sps:$4 sm:$0xff]  }
  0xf4   : > { %v484_v34 = vsel %vm483_vm1, %v481_v32, %v2165_v31  ;;  %v485_v35 = vsel %vm483_vm1, %v482_v33, %v2166_v30  ;;  %v2224_v30 = vld [vmem:[%s3215_s4 + $0x4c] ss:$16 sps:$4 sm:$0xff]   ;;  %v2242_v33 = vld [vmem:[%s3218_s7 + $0x10] sm:$0xff]  }
  0xf5   : > { %v487_v36 = vsel %vm486_vm2, %v484_v34, %v2170_v29  ;;  %v488_v37 = vsel %vm486_vm2, %v485_v35, %v2171_v28  ;;  %v2240_v28 = vld [vmem:[%s3218_s7] sm:$0xff]   ;;  %v2219_v29 = vld [vmem:[%s3215_s4 + $0x28] ss:$16 sps:$4 sm:$0xff]   ;;  %v2227_v32 = vld [vmem:[%s3215_s4 + $0x6c] ss:$16 sps:$4 sm:$0xff]  }
  0xf6   : > { %v489_v39 = vpack.c.bf16 %v488_v37, %v487_v36  ;;  %v2241_v31 = vld [vmem:[%s3218_s7 + $0x8] sm:$0xff]  }
  0xf7   : > { %v2225_v34 = vld [vmem:[%s3215_s4 + $0x68] ss:$16 sps:$4 sm:$0xff]   ;;  %v2230_v35 = vld [vmem:[%s3215_s4 + $0x8c] ss:$16 sps:$4 sm:$0xff]  }
  0xf8   : > { %1794 = vmatmul.mubr.msk.bf16.vlgmr.msra.gmra.mrb[0].mxu0 %vm538_vm3, %v489_v39  ;;  %v2228_v36 = vld [vmem:[%s3215_s4 + $0x88] ss:$16 sps:$4 sm:$0xff]   ;;  %v2233_v37 = vld [vmem:[%s3215_s4 + $0xac] ss:$16 sps:$4 sm:$0xff]  }
  0xf9   : > { %949 = vmatpush1.bf16.msra.mxu0 %v2185_v38  ;;  %980 = vmatprep.mubr.bf16.mxu0 %v2535_v0  ;;  %v2231_v38 = vld [vmem:[%s3215_s4 + $0xa8] ss:$16 sps:$4 sm:$0xff]   ;;  %v2236_v39 = vld [vmem:[%s3215_s4 + $0xcc] ss:$16 sps:$4 sm:$0xff]  }
  0xfa   : > { %950 = vmatprep.subr.bf16.mxu0 %v2191_v41  ;;  %v2239_v41 = vld [vmem:[%s3215_s4 + $0xec] ss:$16 sps:$4 sm:$0xff]  }
  0xfd   : > { %951 = vmatpush1.bf16.msra.mxu0 %v2189_v42  ;;  %v2237_v42 = vld [vmem:[%s3215_s4 + $0xe8] ss:$16 sps:$4 sm:$0xff]  }
  0xfe   : > { %952 = vmatprep.subr.bf16.mxu0 %v2195_v44  ;;  %v2244_v44 = vld [vmem:[%s3218_s7 + $0x20] sm:$0xff]  }
 0x101   : > { %953 = vmatpush1.bf16.msra.mxu0 %v2193_v45  ;;  %v2245_v45 = vld [vmem:[%s3218_s7 + $0x28] sm:$0xff]  }
 0x102   : > { %954 = vmatprep.subr.bf16.mxu0 %v2199_v47  ;;  %v2246_v47 = vld [vmem:[%s3218_s7 + $0x30] sm:$0xff]  }
 0x105   : > { %955 = vmatpush1.bf16.msra.mxu0 %v2197_v48  ;;  %v2247_v48 = vld [vmem:[%s3218_s7 + $0x38] sm:$0xff]  }
 0x106   : > { %956 = vmatprep.subr.bf16.mxu0 %v2203_v50  ;;  %v2252_v50 = vld [vmem:[%s3218_s7 + $0x10] sm:$0xff]  }
 0x109   : > { %957 = vmatpush1.bf16.msra.mxu0 %v2201_v51  ;;  %v2254_v51 = vld [vmem:[%s3218_s7 + $0x18] sm:$0xff]  }
 0x10a   : > { %958 = vmatprep.subr.bf16.mxu0 %v2207_v52  ;;  %v2256_v52 = vld [vmem:[%s3218_s7 + $0x20] sm:$0xff]  }
 0x10d   : > { %959 = vmatpush1.bf16.msra.mxu0 %v2205_v54  ;;  %v2260_v54 = vld [vmem:[%s3218_s7 + $0x30] sm:$0xff]  }
 0x10e   : > { %960 = vmatprep.subr.bf16.mxu0 %v2211_v55  ;;  %v2262_v55 = vld [vmem:[%s3218_s7 + $0x38] sm:$0xff]  }
 0x111   : > { %961 = vmatpush1.bf16.msra.mxu0 %v2209_v57  ;;  %v2962_v57 = vld [vmem:[#allocation7] sm:$0xf] }
 0x112   : > { %962 = vmatprep.subr.bf16.mxu0 %v2215_v58  ;;  %v774_v58 = vsub.s32 1, %v2827_v63  ;;  %v771_v59 = vrot.slane %v2962_v57, %v770_v56 }
 0x114   : > { %v775_v61 = vrot.slane %v2962_v57, %v774_v58 }
 0x115   : > { %963 = vmatpush1.bf16.msra.mxu0 %v2213_v60  ;;  %v1795_v60 = vld [vmem:[%s3214_s3] ss:$0 sm:$0xff] }
 0x116   : > { %1957 = vmatprep.subr.bf16.mxu0 %v2536_v8 }
 0x1cb   : > { %v2830_v2 = vpop.f32.mrb[0].mxu0 }
 0x1cc   : > { %v601_v3 = vmul.f32 %v2830_v2, %v2830_v2  ;;  %v2834_v4 = vpop.f32.mrb[1].mxu0 }
 0x1cd   : > { %v603_v5 = vmul.f32 %v2834_v4, %v2834_v4  ;;  %v580_v6 = vpop.f32.mrb[2].mxu0 }
 0x1ce   : > { %v2838_v7 = vsel %vm592_vm5, %v580_v6, 0.0  ;;  %v582_v9 = vpop.f32.mrb[3].mxu0 }
 0x1cf   : > { %v605_v10 = vadd.f32 %v603_v5, %v601_v3  ;;  %v602_v11 = vmul.f32 %v2838_v7, %v2838_v7  ;;  %v2842_v12 = vsel %vm592_vm5, %v582_v9, 0.0 }
 0x1d0   : > { %v604_v13 = vmul.f32 %v2842_v12, %v2842_v12 }
 0x1d1   : > { %v607_v14 = vmax.f32 %v605_v10, 1e-37 }
 0x1d2   : > { %v606_v15 = vadd.f32 %v604_v13, %v602_v11 }
 0x1d3   : > { %2272 = vlog2.f32 %v607_v14 }
 0x1d4   : > { %v608_v16 = vmax.f32 %v606_v15, 1e-37 }
 0x1d6   : > { %2274 = vlog2.f32 %v608_v16 }
 0x1dd   : > { %v2273_v17 = vpop.eup %2272 }
 0x1de   : > { %v610_v18 = vmul.f32 0.6931472, %v2273_v17 }
 0x1e0   : > { %v2275_v19 = vpop.eup %2274  ;;  %v613_v21 = vmul.f32 0.4342945, %v610_v18 }
 0x1e1   : > { %v612_v20 = vmul.f32 0.6931472, %v2275_v19 }
 0x1e2   : > { %v615_v23 = vmul.f32 10.0, %v613_v21 }
 0x1e3   : > { %v614_v22 = vmul.f32 0.4342945, %v612_v20 }
 0x1e5   : > { %v616_v24 = vmul.f32 10.0, %v614_v22 }
 0x1e7   : > { %v617_v26 = vpack.c.bf16 %v616_v24, %v615_v23 }
 0x1e9   : > { %1954 = vmatmul.mubr.bf16.vlgmr.msra.gmra.mrb[0].mxu1 %v617_v26  ;;  %981 = vmatmul.mubr.bf16.vlgmr.msra.gmra.mrb[4].mxu0 %v617_v26 }
 0x1ea   : > { %992 = vmatpush1.bf16.msra.mxu1 %v2216_v25  ;;  %1023 = vmatprep.mubr.bf16.mxu1 %v2535_v0  ;;  %v2222_v0 = vld [vmem:[%s3215_s4 + $0x48] ss:$16 sps:$4 sm:$0xff]  }
 0x1eb   : > { %993 = vmatprep.subr.bf16.mxu1 %v2221_v27  ;;  %1958 = vmatpush3.bf16.msra.mxu0 %v2240_v28 }
 0x1ec   : > { %1959 = vmatprep.subr.bf16.mxu0 %v2536_v8  ;;  %1973 = vmatprep.mubr.msk.bf16.mxu0 %vm2540_vm4, %v2536_v8 }
 0x1ee   : > { %994 = vmatpush1.bf16.msra.mxu1 %v2219_v29 }
 0x1ef   : > { %995 = vmatprep.subr.bf16.mxu1 %v2224_v30  ;;  %1960 = vmatpush3.bf16.msra.mxu0 %v2241_v31 }
 0x1f0   : > { %1961 = vmatprep.subr.bf16.mxu0 %v2536_v8 }
 0x1f2   : > { %996 = vmatpush1.bf16.msra.mxu1 %v2222_v0 }
 0x1f3   : > { %997 = vmatprep.subr.bf16.mxu1 %v2227_v32  ;;  %1962 = vmatpush3.bf16.msra.mxu0 %v2242_v33 }
 0x1f4   : > { %1963 = vmatprep.subr.bf16.mxu0 %v2536_v8 }
 0x1f6   : > { %998 = vmatpush1.bf16.msra.mxu1 %v2225_v34 }
 0x1f7   : > { %999 = vmatprep.subr.bf16.mxu1 %v2230_v35  ;;  %1964 = vmatpush3.bf16.msra.mxu0 %v2243_v43  ;;  %v2253_v43 = vld [vmem:[%s3217_s6 + $0x10] sm:$0xff]  }
 0x1f8   : > { %1965 = vmatprep.subr.bf16.mxu0 %v2536_v8 }
 0x1fa   : > { %1000 = vmatpush1.bf16.msra.mxu1 %v2228_v36  ;;  %v2249_v36 = vld [vmem:[%s3217_s6] sm:$0xff]  }
 0x1fb   : > { %1001 = vmatprep.subr.bf16.mxu1 %v2233_v37  ;;  %1966 = vmatpush3.bf16.msra.mxu0 %v2244_v44 }
 0x1fc   : > { %1967 = vmatprep.subr.bf16.mxu0 %v2536_v8 }
 0x1fe   : > { %1002 = vmatpush1.bf16.msra.mxu1 %v2231_v38 }
 0x1ff   : > { %1003 = vmatprep.subr.bf16.mxu1 %v2236_v39  ;;  %1968 = vmatpush3.bf16.msra.mxu0 %v2245_v45  ;;  %v778_v39 = vsub.s32 2, %v2827_v63 }
 0x200   : > { %1969 = vmatprep.subr.bf16.mxu0 %v2536_v8 }
 0x202   : > { %1004 = vmatpush1.bf16.msra.mxu1 %v2234_v40  ;;  %v2251_v40 = vld [vmem:[%s3217_s6 + $0x8] sm:$0xff]  }
 0x203   : > { %1005 = vmatprep.subr.bf16.mxu1 %v2239_v41  ;;  %1970 = vmatpush3.bf16.msra.mxu0 %v2246_v47  ;;  %v782_v41 = vsub.s32 3, %v2827_v63 }
 0x204   : > { %1971 = vmatprep.subr.bf16.mxu0 %v2536_v8 }
 0x205   : > { %v783_v44 = vrot.slane %v2962_v57, %v782_v41 }
 0x206   : > { %1006 = vmatpush1.bf16.msra.mxu1 %v2237_v42  ;;  %v779_v42 = vrot.slane %v2962_v57, %v778_v39  ;;  %v2261_v57 = vld [vmem:[%s3217_s6 + $0x30] sm:$0xff]  }
 0x207   : > { %1997 = vmatprep.subr.bf16.mxu1 %v2536_v8  ;;  %1972 = vmatpush3.bf16.msra.mxu0 %v2247_v48 }
 0x208   : > { %1977 = vmatprep.subr.bf16.mxu0 %v2536_v8 }
 0x209   : > { %1024 = vmatmul.mubr.bf16.vlgmr.msra.gmra.mrb[4].mxu1 %v617_v26 }
 0x20a   : > { %2013 = vmatprep.mubr.msk.bf16.mxu1 %vm2540_vm4, %v2536_v8  ;;  %1998 = vmatpush3.bf16.msra.mxu1 %v2248_v46 }
 0x20b   : > { %1999 = vmatprep.subr.bf16.mxu1 %v2536_v8 }
 0x20e   : > { %2000 = vmatpush3.bf16.msra.mxu1 %v2250_v49  ;;  %v2255_v49 = vld [vmem:[%s3217_s6 + $0x18] sm:$0xff]  }
 0x20f   : > { %2001 = vmatprep.subr.bf16.mxu1 %v2536_v8 }
 0x212   : > { %2002 = vmatpush3.bf16.msra.mxu1 %v2252_v50 }
 0x213   : > { %2003 = vmatprep.subr.bf16.mxu1 %v2536_v8 }
 0x216   : > { %2004 = vmatpush3.bf16.msra.mxu1 %v2254_v51 }
 0x217   : > { %2005 = vmatprep.subr.bf16.mxu1 %v2536_v8 }
 0x21a   : > { %2006 = vmatpush3.bf16.msra.mxu1 %v2256_v52 }
 0x21b   : > { %2007 = vmatprep.subr.bf16.mxu1 %v2536_v8 }
 0x21e   : > { %2008 = vmatpush3.bf16.msra.mxu1 %v2258_v53  ;;  %v2257_v53 = vld [vmem:[%s3217_s6 + $0x20] sm:$0xff]  }
 0x21f   : > { %2009 = vmatprep.subr.bf16.mxu1 %v2536_v8 }
 0x222   : > { %2010 = vmatpush3.bf16.msra.mxu1 %v2260_v54  ;;  %v2259_v54 = vld [vmem:[%s3217_s6 + $0x28] sm:$0xff]  }
 0x223   : > { %2011 = vmatprep.subr.bf16.mxu1 %v2536_v8 }
 0x226   : > { %2012 = vmatpush3.bf16.msra.mxu1 %v2262_v55 }
 0x227   : > { %2017 = vmatprep.subr.bf16.mxu1 %v2536_v8 }
 0x2bc   : > { %v723_v62 = vpop.f32.mrb[0].mxu1  ;;  %v982_v1 = vpop.f32.mrb[4].mxu0 }
 0x2bd   : > { %v724_v3 = vadd.f32 %v1795_v60, %v723_v62  ;;  %v983_v5 = vadd.f32 %v982_v1, %v771_v59  ;;  %v1955_v6 = vpop.f32.mrb[1].mxu1  ;;  %v984_v9 = vpop.f32.mrb[5].mxu0 }
 0x2be   : > { %v985_v10 = vadd.f32 %v984_v9, %v775_v61  ;;  %v726_v11 = vpop.f32.mrb[2].mxu1  ;;  %v986_v13 = vpop.f32.mrb[6].mxu0 }
 0x2bf   : > { %2276 = vtanh.f32 %v724_v3  ;;  %v727_v14 = vadd.f32 %v1795_v60, %v726_v11  ;;  %v987_v15 = vadd.f32 %v986_v13, %v771_v59  ;;  %v1956_v16 = vpop.f32.mrb[3].mxu1  ;;  %v988_v17 = vpop.f32.mrb[7].mxu0 }
 0x2c0   : > { %2278 = vtanh.f32 %v983_v5  ;;  %v989_v18 = vadd.f32 %v988_v17, %v775_v61  ;;  %v2266_v16 = vld [vmem:[%s3217_s6 + $0x10] sm:$0xff]   ;;  %v2267_v17 = vld [vmem:[%s3217_s6 + $0x18] sm:$0xff]  }
 0x2c1   : > { %2280 = vtanh.f32 %v985_v10 }
 0x2c2   : > { %2282 = vtanh.f32 %v727_v14  ;;  %v2264_v14 = vld [vmem:[%s3217_s6] sm:$0xff]  }
 0x2c3   : > { %2284 = vtanh.f32 %v987_v15 }
 0x2c4   : > { %2286 = vtanh.f32 %v989_v18  ;;  %v2268_v18 = vld [vmem:[%s3217_s6 + $0x20] sm:$0xff]  }
 0x2c9   : > { %v2277_v19 = vpop.eup %2276 }
 0x2ca   : > { %v2279_v20 = vpop.eup %2278  ;;  %732 = vst [vmem:[%s2977_s15] sm:$0xff] %v2277_v19  ;;  %v2269_v19 = vld [vmem:[%s3217_s6 + $0x28] sm:$0xff]  }
 0x2cb   : > { %v2281_v21 = vpop.eup %2280  ;;  %v1057_v22 = vmul.f32 %v2279_v20, %v2834_v4  ;;  %v1050_v23 = vmul.f32 %v2279_v20, %v2830_v2  ;;  %1042 = vst [vmem:[%s2982_s12] sm:$0xff] %v2279_v20  ;;  %v2270_v20 = vld [vmem:[%s3217_s6 + $0x30] sm:$0xff]  }
 0x2cc   : > { %v2283_v24 = vpop.eup %2282  ;;  %v1059_v25 = vmul.f32 %v2281_v21, %v2830_v2  ;;  %v1052_v26 = vmul.f32 %v2281_v21, %v2834_v4  ;;  %1043 = vst [vmem:[%s2982_s12 + $0x8] sm:$0xff] %v2281_v21  ;;  %v2271_v21 = vld [vmem:[%s3217_s6 + $0x38] sm:$0xff]  }
 0x2cd   : > { %v2285_v27 = vpop.eup %2284  ;;  %733 = vst [vmem:[%s2977_s15 + $0x8] sm:$0xff] %v2283_v24 }
 0x2ce   : > { %v2287_v28 = vpop.eup %2286  ;;  %v1058_v29 = vmul.f32 %v2285_v27, %v2842_v12  ;;  %v1061_v30 = vadd.f32 %v1059_v25, %v1057_v22  ;;  %v1051_v31 = vmul.f32 %v2285_v27, %v2838_v7  ;;  %v1054_v0 = vsub.f32 %v1050_v23, %v1052_v26  ;;  %1046 = vst [vmem:[%s2982_s12 + $0x20] sm:$0xff] %v2285_v27 }
 0x2cf   : > { %v1060_v32 = vmul.f32 %v2287_v28, %v2838_v7  ;;  %v1053_v33 = vmul.f32 %v2287_v28, %v2842_v12  ;;  %1047 = vst [vmem:[%s2982_s12 + $0x28] sm:$0xff] %v2287_v28 }
 0x2d1   : > { %v1062_v34 = vadd.f32 %v1060_v32, %v1058_v29  ;;  %v1055_v35 = vsub.f32 %v1051_v31, %v1053_v33 }
 0x2d3   : > { %v1063_v37 = vpack.c.bf16 %v1062_v34, %v1061_v30  ;;  %v2998_v38 = vpack.c.bf16 %v1055_v35, %v1054_v0 }
 0x2d5   : > { %1974 = vmatmul.mubr.bf16.vlgmr.msra.gmra.mrb[8].mxu0 %v1063_v37 }
 0x2d6   : > { %1978 = vmatpush3.bf16.msra.mxu0 %v2249_v36  ;;  %1993 = vmatprep.mubr.msk.bf16.mxu0 %vm2540_vm4, %v2536_v8 }
 0x2d7   : > { %1979 = vmatprep.subr.bf16.mxu0 %v2536_v8 }
 0x2da   : > { %1980 = vmatpush3.bf16.msra.mxu0 %v2251_v40 }
 0x2db   : > { %1981 = vmatprep.subr.bf16.mxu0 %v2536_v8 }
 0x2dc   : > { %v1025_v45 = vpop.f32.mrb[4].mxu1 }
 0x2dd   : > { %v1026_v46 = vadd.f32 %v1025_v45, %v779_v42  ;;  %v1027_v47 = vpop.f32.mrb[5].mxu1 }
 0x2de   : > { %1982 = vmatpush3.bf16.msra.mxu0 %v2253_v43  ;;  %v1028_v63 = vadd.f32 %v1027_v47, %v783_v44  ;;  %v1029_v48 = vpop.f32.mrb[6].mxu1 }
 0x2df   : > { %2288 = vtanh.f32 %v1026_v46  ;;  %v1030_v50 = vadd.f32 %v1029_v48, %v779_v42  ;;  %v1031_v51 = vpop.f32.mrb[7].mxu1  ;;  %1983 = vmatprep.subr.bf16.mxu0 %v2536_v8 }
 0x2e0   : > { %2290 = vtanh.f32 %v1028_v63  ;;  %v1032_v52 = vadd.f32 %v1031_v51, %v783_v44 }
 0x2e1   : > { %2292 = vtanh.f32 %v1030_v50 }
 0x2e2   : > { %2294 = vtanh.f32 %v1032_v52  ;;  %1984 = vmatpush3.bf16.msra.mxu0 %v2255_v49 }
 0x2e3   : > { %1985 = vmatprep.subr.bf16.mxu0 %v2536_v8 }
 0x2e6   : > { %1986 = vmatpush3.bf16.msra.mxu0 %v2257_v53 }
 0x2e7   : > { %1987 = vmatprep.subr.bf16.mxu0 %v2536_v8 }
 0x2e9   : > { %v2289_v55 = vpop.eup %2288 }
 0x2ea   : > { %v2291_v56 = vpop.eup %2290  ;;  %1988 = vmatpush3.bf16.msra.mxu0 %v2259_v54  ;;  %v1292_v58 = vmul.f32 %v2289_v55, %v2834_v4  ;;  %v1285_v59 = vmul.f32 %v2289_v55, %v2830_v2  ;;  %1044 = vst [vmem:[%s2982_s12 + $0x10] sm:$0xff] %v2289_v55 }
 0x2eb   : > { %v2293_v60 = vpop.eup %2292  ;;  %1989 = vmatprep.subr.bf16.mxu0 %v2536_v8  ;;  %v1294_v61 = vmul.f32 %v2291_v56, %v2830_v2  ;;  %v1287_v62 = vmul.f32 %v2291_v56, %v2834_v4  ;;  %1045 = vst [vmem:[%s2982_s12 + $0x18] sm:$0xff] %v2291_v56  ;;  %v2263_v2 = vld [vmem:[%s3217_s6 + $0x38] sm:$0xff]  }
 0x2ec   : > { %v2295_v1 = vpop.eup %2294  ;;  %v1293_v3 = vmul.f32 %v2293_v60, %v2842_v12  ;;  %v1286_v5 = vmul.f32 %v2293_v60, %v2838_v7  ;;  %1048 = vst [vmem:[%s2982_s12 + $0x30] sm:$0xff] %v2293_v60 }
 0x2ed   : > { %v1295_v6 = vmul.f32 %v2295_v1, %v2838_v7  ;;  %v1296_v9 = vadd.f32 %v1294_v61, %v1292_v58  ;;  %v1288_v10 = vmul.f32 %v2295_v1, %v2842_v12  ;;  %v1289_v11 = vsub.f32 %v1285_v59, %v1287_v62  ;;  %1049 = vst [vmem:[%s2982_s12 + $0x38] sm:$0xff] %v2295_v1  ;;  %v2265_v12 = vld [vmem:[%s3217_s6 + $0x8] sm:$0xff]   ;;  %s2541_s12 = smov [#allocation9]  }
 0x2ee   : > { %1990 = vmatpush3.bf16.msra.mxu0 %v2261_v57  ;;  %s2384_s28 = sshll.u32 %s2541_s12, 4  ;;  %s2385_s28 = int_to_ptr.vmem [resolvable:$false] %s2384_s28 }
 0x2ef   : > { %1991 = vmatprep.subr.bf16.mxu0 %v2536_v8  ;;  %v1297_v4 = vadd.f32 %v1295_v6, %v1293_v3  ;;  %v1290_v13 = vsub.f32 %v1286_v5, %v1288_v10  ;;  %s2386_s27 = scalar_lea.vmem %s2385_s28, 2048  ;;  %p2387_p6 = scmp.lt.s32.totalorder %s3081_s17, %s2385_s28 }
 0x2f0   : > { %p2388_p7 = scmp.lt.s32.totalorder %s2386_s27, %s2380_s30 }
 0x2f1   : > { %v1298_v15 = vpack.c.bf16 %v1297_v4, %v1296_v9  ;;  %v1291_v7 = vpack.c.bf16 %v1290_v13, %v1289_v11 }
 0x2f2   : > { %1992 = vmatpush3.bf16.msra.mxu0 %v2263_v2  ;;  %p2389_p9 = por %p2388_p7, %p2387_p6 }
 0x2f3   : > { %2014 = vmatmul.mubr.bf16.vlgmr.msra.gmra.mrb[8].mxu1 %v1298_v15 }
 0x2f4   : > { %2018 = vmatpush3.bf16.msra.mxu1 %v2264_v14  ;;  %2033 = vmatprep.mubr.msk.bf16.mxu1 %vm2540_vm4, %v2536_v8  ;;  %p2390_p12 = pnand %p2389_p9, %p2383_p5 }
 0x2f5   : > { %1994 = vmatmul.mubr.bf16.vlgmr.msra.gmra.mrb[8].mxu0 %v2998_v38  ;;  %2019 = vmatprep.subr.bf16.mxu1 %v2536_v8 }
 0x2f8   : > { %2020 = vmatpush3.bf16.msra.mxu1 %v2265_v12 }
 0x2f9   : > { %2021 = vmatprep.subr.bf16.mxu1 %v2536_v8 }
 0x2fc   : > { %2022 = vmatpush3.bf16.msra.mxu1 %v2266_v16 }
 0x2fd   : > { %2023 = vmatprep.subr.bf16.mxu1 %v2536_v8 }
 0x300   : > { %2024 = vmatpush3.bf16.msra.mxu1 %v2267_v17 }
 0x301   : > { %2025 = vmatprep.subr.bf16.mxu1 %v2536_v8 }
 0x304   : > { %2026 = vmatpush3.bf16.msra.mxu1 %v2268_v18 }
 0x305   : > { %2027 = vmatprep.subr.bf16.mxu1 %v2536_v8 }
 0x308   : > { %2028 = vmatpush3.bf16.msra.mxu1 %v2269_v19 }
 0x309   : > { %2029 = vmatprep.subr.bf16.mxu1 %v2536_v8 }
 0x30c   : > { %2030 = vmatpush3.bf16.msra.mxu1 %v2270_v20 }
 0x30d   : > { %2031 = vmatprep.subr.bf16.mxu1 %v2536_v8 }
 0x310   : > { %2032 = vmatpush3.bf16.msra.mxu1 %v2271_v21 }
 0x313   : > { %2034 = vmatmul.mubr.bf16.vlgmr.msra.gmra.mrb[8].mxu1 %v1291_v7 }
 0x314   : > { %2393 = shalt.err (!%p2390_p12)
}
 0x315   : > { %s2394_s19 = scalar_lea.hbm %s3088_s25, 1024  ;;  %s2398_s20 = scalar_lea.hbm %s3220_s9, 2048 }
 0x316   : > { %p2395_p8 = scmp.ne.s32.totalorder %s3088_s25, %s2394_s19  ;;  %p2399_p10 = scmp.lt.u32.totalorder %s3088_s25, %s3220_s9 }
 0x317   : > { %p2400_p11 = scmp.lt.u32.totalorder %s2398_s20, %s2394_s19  ;;  %p2402_p13 = scmp.lt.u32.totalorder %s2394_s19, %s3088_s25 }
 0x318   : > { %p2396_p4 = pnand %p2395_p8, %p3252_p2 }
 0x319   : > { %p2401_p0 = por %p2400_p11, %p2399_p10 }
 0x31a   : > { %p2397_p1 = pneg %p2396_p4 }
 0x31b   : > { %p2403_p3 = por %p2402_p13, %p2401_p0 }
 0x31d   : > { %p2404_p5 = pnand %p2403_p3, %p2397_p1 }
 0x31f   : > { %2407 = shalt.err (!%p2404_p5)
}
 0x320   : > { %s2542_s13 = smov 512   ;;  %s1889_s30 = sshll.u32 %s2518_s16, 8 }
 0x321   : > { %2059 = dma.vmem_to_hbm [thread:$0]  (%p3252_p2), %s3081_s17, 1024, %s3088_s25, %s3090_s2, %s2542_s13, %s2542_s13, %s2539_s21  }
 0x322   : > { %s1546_s12 = sshll.u32 %s2977_s15, 4  ;;  %s3122_s19 = scalar_lea.hbm %s3219_s8, %s1889_s30  ;;  %s3124_s12 = int_to_ptr.vmem [resolvable:$true] %s1546_s12 }
 0x323   : > { %s1521_s18 = scalar_lea.sflag [#allocation4], %s2971_s22  ;;  %s2408_s29 = scalar_lea.vmem %s3124_s12, 256 }
 0x324   : > { %p2409_p6 = scmp.ne.s32.totalorder %s3124_s12, %s2408_s29  ;;  %s2543_s21 = smov [#allocation8]  }
 0x325   : > { %s2412_s17 = sshll.u32 %s2543_s21, 4  ;;  %s2413_s17 = int_to_ptr.vmem [resolvable:$false] %s2412_s17 }
 0x326   : > { %p2410_p7 = pnand %p2409_p6, %p3252_p2  ;;  %s2414_s15 = scalar_lea.vmem %s2413_s17, 512 }
 0x327   : > { %p2415_p12 = scmp.lt.s32.totalorder %s3124_s12, %s2413_s17  ;;  %p2416_p8 = scmp.lt.s32.totalorder %s2414_s15, %s2408_s29 }
 0x328   : > { %p2411_p9 = pneg %p2410_p7 }
 0x329   : > { %p2417_p4 = por %p2416_p8, %p2415_p12 }
 0x32b   : > { %p2418_p1 = pnand %p2417_p4, %p2411_p9 }
 0x32d   : > { %2421 = shalt.err (!%p2418_p1)
}
 0x32e   : > { %s2422_s25 = scalar_lea.hbm %s3122_s19, 256  ;;  %s2426_s11 = scalar_lea.hbm %s3219_s8, 512 }
 0x32f   : > { %p2423_p10 = scmp.ne.s32.totalorder %s3122_s19, %s2422_s25  ;;  %p2427_p13 = scmp.lt.u32.totalorder %s3122_s19, %s3219_s8 }
 0x330   : > { %p2428_p3 = scmp.lt.u32.totalorder %s2426_s11, %s2422_s25  ;;  %p2430_p6 = scmp.lt.u32.totalorder %s2422_s25, %s3122_s19 }
 0x331   : > { %p2424_p11 = pnand %p2423_p10, %p3252_p2 }
 0x332   : > { %p2429_p5 = por %p2428_p3, %p2427_p13 }
 0x333   : > { %p2425_p0 = pneg %p2424_p11 }
 0x334   : > { %p2431_p7 = por %p2430_p6, %p2429_p5 }
 0x336   : > { %p2432_p9 = pnand %p2431_p7, %p2425_p0 }
 0x338   : > { %2435 = shalt.err (!%p2432_p9)
}
 0x339   : > { %s2544_s27 = smov 128   ;;  %s2545_s29 = smov 8   ;;  %vm1282_vm6 = vcmask 519168  }
 0x33a   : > { %2058 = dma.vmem_to_hbm [thread:$0]  (%p3252_p2), %s3124_s12, 256, %s3122_s19, %s1521_s18, %s2544_s27, %s2544_s27, %s2545_s29  }
 0x33b   : > { %s430_s21 = scalar_lea.vmem [#allocation11], %s1776_s24  ;;  %s3161_s12 = scalar_lea.hbm %s3221_s10, %s1889_s30 }
 0x33c   : > { %s1583_s17 = sshll.u32 %s430_s21, 4  ;;  %s2546_s18 = smov [#allocation11]   ;;  %s3154_s17 = int_to_ptr.vmem [resolvable:$true] %s1583_s17 }
 0x33d   : > { %s2436_s19 = scalar_lea.vmem %s3154_s17, 256  ;;  %s2440_s15 = sshll.u32 %s2546_s18, 4  ;;  %s2441_s15 = int_to_ptr.vmem [resolvable:$false] %s2440_s15 }
 0x33e   : > { %p2437_p12 = scmp.ne.s32.totalorder %s3154_s17, %s2436_s19  ;;  %s2442_s16 = scalar_lea.vmem %s2441_s15, 512 }
 0x33f   : > { %p2443_p1 = scmp.lt.s32.totalorder %s3154_s17, %s2441_s15  ;;  %p2444_p10 = scmp.lt.s32.totalorder %s2442_s16, %s2436_s19 }
 0x340   : > { %p2438_p8 = pnand %p2437_p12, %p3252_p2 }
 0x341   : > { %p2445_p11 = por %p2444_p10, %p2443_p1 }
 0x342   : > { %p2439_p4 = pneg %p2438_p8 }
 0x344   : > { %p2446_p0 = pnand %p2445_p11, %p2439_p4 }
 0x3c8   : > { %v1267_v8 = vpop.f32.mrb[8].mxu0 }
 0x3c9   : > { %v1885_v22 = vpack.c.bf16 %v1267_v8, %v1267_v8  ;;  %v1995_v23 = vpop.f32.mrb[9].mxu0 }
 0x3ca   : > { %v1270_v24 = vpop.f32.mrb[10].mxu0 }
 0x3cb   : > { %1283 = vst.msk [vmem:[%s430_s21] sm:$0xf] %vm1282_vm6, %v1885_v22  ;;  %v1886_v25 = vpack.c.bf16 %v1270_v24, %v1270_v24  ;;  %v1996_v26 = vpop.f32.mrb[11].mxu0 }
 0x3cd   : > { %1284 = vst.msk [vmem:[%s430_s21 + $0x4] sm:$0xf] %vm1282_vm6, %v1886_v25 }
 0x3e6   : > { %v1502_v27 = vpop.f32.mrb[8].mxu1 }
 0x3e7   : > { %v1887_v28 = vpack.c.bf16 %v1502_v27, %v1502_v27  ;;  %v2035_v29 = vpop.f32.mrb[9].mxu1 }
 0x3e8   : > { %v1505_v30 = vpop.f32.mrb[10].mxu1 }
 0x3e9   : > { %1872 = vst.msk [vmem:[%s430_s21 + $0x8] sm:$0xf] %vm1282_vm6, %v1887_v28  ;;  %v1888_v31 = vpack.c.bf16 %v1505_v30, %v1505_v30  ;;  %v2036_v0 = vpop.f32.mrb[11].mxu1 }
 0x3eb   : > { %1873 = vst.msk [vmem:[%s430_s21 + $0xc] sm:$0xf] %vm1282_vm6, %v1888_v31 }
 0x3ec   : > { %2449 = shalt.err (!%p2446_p0)
}
 0x3ed   : > { %s2450_s30 = scalar_lea.hbm %s3161_s12, 256  ;;  %s2454_s26 = scalar_lea.hbm %s3221_s10, 512 }
 0x3ee   : > { %p2451_p13 = scmp.ne.s32.totalorder %s3161_s12, %s2450_s30  ;;  %p2455_p6 = scmp.lt.u32.totalorder %s3161_s12, %s3221_s10 }
 0x3ef   : > { %p2456_p7 = scmp.lt.u32.totalorder %s2454_s26, %s2450_s30  ;;  %p2458_p12 = scmp.lt.u32.totalorder %s2450_s30, %s3161_s12 }
 0x3f0   : > { %p2452_p3 = pnand %p2451_p13, %p3252_p2 }
 0x3f1   : > { %p2457_p9 = por %p2456_p7, %p2455_p6 }
 0x3f2   : > { %p2453_p5 = pneg %p2452_p3 }
 0x3f3   : > { %p2459_p8 = por %p2458_p12, %p2457_p9 }
 0x3f5   : > { %p2460_p4 = pnand %p2459_p8, %p2453_p5 }
 0x3f7   : > { %2463 = shalt.err (!%p2460_p4)
}
 0x3f8   : > { %s2547_s28 = smov 64   ;;  %s2548_s27 = smov 4  }
 0x3f9   : > { %2060 = dma.vmem_to_hbm [thread:$0]  (%p3252_p2), %s3154_s17, 256, %s3161_s12, %s3090_s2, %s2547_s28, %s2547_s28, %s2548_s27  }
 0x3fa PF: > { %s3253_s29 = sld [smem:[#allocation19_spill]]  ;;  %s3254_s21 = sld [smem:[#allocation16_spill]] }
 0x3fb   : > { %s3255_s22 = sld [smem:[#allocation21_spill]] }
 0x400   : > { %p2090_p1 = scmp.ge.s32.totalorder %s3253_s29, 2  ;;  %s1598_s24 = sand.u32 1, %s3254_s21  }
 0x401   : > { %p3256_p10 = scmp.ne.s32.totalorder %s3255_s22, 0  ;;  %s1599_s19 = scalar_lea.sflag [#allocation4], %s1598_s24 }
 0x403   : > { %p2075_p11 = pnand %p2090_p1, %p3256_p10 }
 0x405   : > { %2497 = dma.done.wait (!%p2075_p11), %s1599_s19, 256  }
 0x406   : > { %2499 = vsyncadd (!%p2075_p11), %s1599_s19, 4294967040  ;;  %s3257_s18 = sadd.s32 4294967294, %s3253_s29  }
 0x407   : > { %s1607_s15 = sand.u32 1, %s3257_s18  }
 0x408   : > { %s1608_s16 = scalar_lea.sflag [#allocation10], %s1607_s15 }
 0x409   : > { %2501 = dma.done.wait (!%p2075_p11), %s1608_s16, 1280  }
 0x40a   : > { %2503 = vsyncadd (!%p2075_p11), %s1608_s16, 4294966016  ;;  %s29_s18 = sadd.s32 1, %s3253_s29   ;;  %s3258_s23 = sld [smem:[#allocation17_spill]] }
 0x40b   : > { %p26_p2 = scmp.ge.s32.totalorder %s29_s18, 4   ;;  %s3259_s15 = sld [smem:[#allocation22_spill]] }
 0x40c   : > { %s3260_s16 = sld [smem:[#allocation18_spill]]  ;;  %s3261_s17 = sld [smem:[#allocation20_spill]] }
 0x40d   : > { %s3262_s13 = smov %s2510_s14  ;;  %28 = sbr.rel (!%p26_p2) target bundleno = 10 (0xa), region = 137 }
 0x410   : > { %s3263_s14 = smov %s3258_s23 }
 0x414   :  { %1622 = vsyncpa [#allocation3], 1 }
 0x415   :  { %1624 = vsyncpa [#allocation3 + $0x1], 1 }
 0x416   :  { %1625 = vsyncpa [#allocation6], 1 }
 0x417   :  { %1626 = vsyncpa [#allocation4], 1 }
 0x418   :  { %1628 = vsyncpa [#allocation4 + $0x1], 1 }
 0x419   :  { %1629 = vsyncpa [#allocation10], 1 }
 0x41a   :  { %1631 = vsyncpa [#allocation10 + $0x1], 1 }

</bundles_post_ra>
